<compile_context>
chip_gen: v6e
topology: v6e:2x2x1
jax: 0.10.0
libtpu: 0.0.40
codegen_flags: <defaults>
</compile_context>

<pallas_src>
import functools

import jax
import jax.numpy as jnp
from jax.experimental import pallas as pl
from jax.experimental.pallas import tpu as pltpu


# ----------------------------------------------------------------------------
# Kernel: one fused fc1 -> relu -> fc2 -> relu -> head chain over a batch tile.
# The same body serves the single critic (head width 1) and the fused twin
# critic (lane-stacked fc1/fc2 + block-diagonal head, output width 2).
# ----------------------------------------------------------------------------
def _mlp_kernel(x_ref, w1_ref, b1_ref, w2_ref, b2_ref, w3_ref, b3_ref, o_ref):
    # x_ref : [TB, Din]      w1_ref: [Din, F1]   b1_ref: [1, F1]  (f32)
    # w2_ref: [F1, F2]       b2_ref: [1, F2]     (f32)
    # w3_ref: [F2, n_out]    b3_ref: [1, n_out]  (f32)
    # o_ref : [TB, n_out]    (f32)
    dd = w1_ref.dtype                       # matmul operand precision
    x = x_ref[...].astype(dd)               # no-op when x already streams at dd

    h1 = jnp.dot(x, w1_ref[...], preferred_element_type=jnp.float32) + b1_ref[...]
    h1 = jnp.maximum(h1, 0.0)               # f32 bias/ReLU on the VPU (no bf16 VPU on v5e)

    h2 = jnp.dot(h1.astype(dd), w2_ref[...],
                 preferred_element_type=jnp.float32) + b2_ref[...]
    h2 = jnp.maximum(h2, 0.0)

    q = jnp.dot(h2.astype(dd), w3_ref[...],
                preferred_element_type=jnp.float32) + b3_ref[...]
    # Head stores are lane-sparse (n_out in {1,2}) but output bytes are tiny;
    # lane-dense padding is not worth it here.
    o_ref[...] = q.astype(o_ref.dtype)


# ----------------------------------------------------------------------------
# Grid / tiling helpers
# ----------------------------------------------------------------------------
def _resident(shape):
    # Full-array block whose index never changes with the grid step -> buffer
    # stays VMEM-resident across all batch tiles (no re-DMA).
    return pl.BlockSpec(shape, lambda i: (0,) * len(shape))


@functools.lru_cache(maxsize=1)
def _detect_num_cores():
    """Best-effort TensorCore count of the local chip (1 on v5e/v6e, 2 on v7x)."""
    try:
        d = jax.devices()[0]
        nc = getattr(d, "num_cores", None)
        if nc is None:
            kind = (getattr(d, "device_kind", "") or "").lower()
            nc = 2 if "v7" in kind else 1
        return max(1, int(nc))
    except Exception:  # pragma: no cover - defensive
        return 1


def _batch_tiling(batch, batch_tile, num_cores):
    """Pick (tile_rows, n_grid_steps).

    * tile is a multiple of 8 (sublane constraint) unless it covers the batch.
    * single-TC chips: largest tile that covers the batch (grid=(1,)) — extra
      grid steps are a serial loop with ~0.35us/step overhead, no benefit.
    * multi-TC chips (v7x): force >= num_cores steps when the batch is big
      enough so the "parallel" axis gives every TensorCore work.
    """
    tile = max(8, (batch_tile // 8) * 8)
    if num_cores > 1 and batch >= 8 * num_cores:
        per_core = -(-batch // num_cores)          # ceil(batch / num_cores)
        per_core = -(-per_core // 8) * 8           # round up to a multiple of 8
        tile = min(tile, per_core)
    if batch <= tile:
        return batch, 1                            # single grid point, full batch
    return tile, pl.cdiv(batch, tile)


# ----------------------------------------------------------------------------
# Core pallas_call wrapper (shared by single and twin paths)
# ----------------------------------------------------------------------------
def _mlp_forward(x, w1, b1, w2, b2, w3, b3, *, batch_tile, num_cores):
    B, Din = x.shape
    F1 = w1.shape[1]
    F2 = w2.shape[1]
    n_out = w3.shape[1]

    if num_cores is None:
        num_cores = _detect_num_cores()
    tb, n_blocks = _batch_tiling(B, batch_tile, num_cores)

    x_bytes = int(B) * int(Din) * jnp.dtype(x.dtype).itemsize
    w_bytes = sum(int(a.size) * jnp.dtype(a.dtype).itemsize
                  for a in (w1, b1, w2, b2, w3, b3))
    cost = pl.CostEstimate(
        flops=int(2 * B * (Din * F1 + F1 * F2 + F2 * n_out)),
        transcendentals=0,
        bytes_accessed=int(x_bytes + w_bytes + B * n_out * 4),
    )

    in_specs = [
        pl.BlockSpec((tb, Din), lambda i: (i, 0)),     # streamed batch tile
        _resident(w1.shape), _resident(b1.shape),      # VMEM-resident weights
        _resident(w2.shape), _resident(b2.shape),
        _resident(w3.shape), _resident(b3.shape),
    ]
    return pl.pallas_call(
        _mlp_kernel,
        out_shape=jax.ShapeDtypeStruct((B, n_out), jnp.float32),
        grid=(n_blocks,),
        in_specs=in_specs,
        out_specs=pl.BlockSpec((tb, n_out), lambda i: (i, 0)),
        compiler_params=pltpu.CompilerParams(
            dimension_semantics=("parallel",),         # megacore-shard on v7x
        ),
        cost_estimate=cost,
    )(x, w1, b1, w2, b2, w3, b3)


# ----------------------------------------------------------------------------
# Parameter preparation (hoisted OFF the hot path: build once, reuse per step)
# ----------------------------------------------------------------------------
def prepare_critic_params(params, *, use_bf16=False):
    """One-time prep of a single critic's parameters for critic_apply."""
    dd = jnp.bfloat16 if use_bf16 else jnp.float32
    return {
        "w1": params["w1"].astype(dd),                       # [Ds+Da, F1]
        "b1": params["b1"].reshape(1, -1).astype(jnp.float32),
        "w2": params["w2"].astype(dd),                       # [F1, F2]
        "b2": params["b2"].reshape(1, -1).astype(jnp.float32),
        "w3": params["w3"].astype(dd),                       # [F2, 1]
        "b3": params["b3"].reshape(1, -1).astype(jnp.float32),
    }


def _block_diag2(a, b):
    r1, c1 = a.shape
    r2, c2 = b.shape
    out = jnp.zeros((r1 + r2, c1 + c2), dtype=a.dtype)
    out = out.at[:r1, :c1].set(a)
    out = out.at[r1:, c1:].set(b)
    return out


def prepare_twin_params(params_q1, params_q2, *, use_bf16=False):
    """One-time lane-dense packing of both SAC critics.

    fc1 weights sit side-by-side in lanes ([Din, 2*F1]); fc2 and the head are
    block-diagonal ([2*F1, 2*F2], [2*F2, 2]) so a single matmul chain evaluates
    both critics and writes q1/q2 into output lanes 0/1.
    """
    dd = jnp.bfloat16 if use_bf16 else jnp.float32
    w1 = jnp.concatenate([params_q1["w1"], params_q2["w1"]], axis=1)
    b1 = jnp.concatenate([params_q1["b1"], params_q2["b1"]])
    w2 = _block_diag2(params_q1["w2"], params_q2["w2"])
    b2 = jnp.concatenate([params_q1["b2"], params_q2["b2"]])
    w3 = _block_diag2(params_q1["w3"], params_q2["w3"])
    b3 = jnp.concatenate([params_q1["b3"], params_q2["b3"]])
    return {
        "w1": w1.astype(dd),
        "b1": b1.reshape(1, -1).astype(jnp.float32),
        "w2": w2.astype(dd),
        "b2": b2.reshape(1, -1).astype(jnp.float32),
        "w3": w3.astype(dd),
        "b3": b3.reshape(1, -1).astype(jnp.float32),
    }


# ----------------------------------------------------------------------------
# Hot-path apply functions (take already-prepared params)
# ----------------------------------------------------------------------------
@functools.partial(jax.jit, static_argnames=("batch_tile", "num_cores"))
def critic_apply(prepared, state, action, *, batch_tile=4096, num_cores=None):
    """CriticNetwork.forward(state, action) -> q1 [B, 1] float32."""
    # Concat fuses with the (optional) bf16 cast into one cheap XLA op; fc1 is
    # then a single lane/depth-dense matmul instead of a K=8 second matmul.
    x = jnp.concatenate([state, action], axis=1).astype(prepared["w1"].dtype)
    return _mlp_forward(x, prepared["w1"], prepared["b1"], prepared["w2"],
                        prepared["b2"], prepared["w3"], prepared["b3"],
                        batch_tile=batch_tile, num_cores=num_cores)


@functools.partial(jax.jit, static_argnames=("batch_tile", "num_cores"))
def critic_twin_apply(prepared_twin, state, action, *, batch_tile=4096,
                      num_cores=None):
    """Fused SAC twin critics: one pallas_call -> (q1, q2), each [B, 1] f32."""
    x = jnp.concatenate([state, action], axis=1).astype(prepared_twin["w1"].dtype)
    out = _mlp_forward(x, prepared_twin["w1"], prepared_twin["b1"],
                       prepared_twin["w2"], prepared_twin["b2"],
                       prepared_twin["w3"], prepared_twin["b3"],
                       batch_tile=batch_tile, num_cores=num_cores)
    return out[:, 0:1], out[:, 1:2]


def critic_forward(state, action, params, *, use_bf16=False, batch_tile=4096,
                   num_cores=None):
    """Convenience wrapper (raw params). For training loops, hoist the prep:
    build `prepare_critic_params` once and call `critic_apply` directly."""
    return critic_apply(prepare_critic_params(params, use_bf16=use_bf16),
                        state, action, batch_tile=batch_tile,
                        num_cores=num_cores)


# ----------------------------------------------------------------------------
# Parameter init (mimics nn.Linear: U(-1/sqrt(fan_in), 1/sqrt(fan_in)));
# weights are stored [in_features, out_features].
# ----------------------------------------------------------------------------
def init_critic_params(key, input_dims, fc1_dims, fc2_dims, n_actions):
    d_in = input_dims[0] + n_actions

    def linear_init(k, fan_in, fan_out):
        kw, kb = jax.random.split(k)
        bound = 1.0 / jnp.sqrt(fan_in)
        w = jax.random.uniform(kw, (fan_in, fan_out), jnp.float32, -bound, bound)
        b = jax.random.uniform(kb, (fan_out,), jnp.float32, -bound, bound)
        return w, b

    k1, k2, k3 = jax.random.split(key, 3)
    w1, b1 = linear_init(k1, d_in, fc1_dims)
    w2, b2 = linear_init(k2, fc1_dims, fc2_dims)
    w3, b3 = linear_init(k3, fc2_dims, 1)
    return {"w1": w1, "b1": b1, "w2": w2, "b2": b2, "w3": w3, "b3": b3}


# Pure-JAX reference (same concat-then-matmul structure as the PyTorch module;
# dot_dtype mirrors the kernel's matmul-operand precision so the bf16 path can
# be checked tightly).
def critic_reference(state, action, params, dot_dtype=jnp.float32):
    x = jnp.concatenate([state, action], axis=1).astype(dot_dtype)
    h1 = jnp.maximum(
        jnp.dot(x, params["w1"].astype(dot_dtype),
                preferred_element_type=jnp.float32) + params["b1"], 0.0)
    h2 = jnp.maximum(
        jnp.dot(h1.astype(dot_dtype), params["w2"].astype(dot_dtype),
                preferred_element_type=jnp.float32) + params["b2"], 0.0)
    return (jnp.dot(h2.astype(dot_dtype), params["w3"].astype(dot_dtype),
                    preferred_element_type=jnp.float32) + params["b3"])


if __name__ == "__main__":
    batch = 8
    input_dims = (32,)
    n_actions = 8
    fc1_dims, fc2_dims = 64, 64

    key = jax.random.PRNGKey(0)
    kp1, kp2, ks, ka, ks2, ka2 = jax.random.split(key, 6)

    params_q1 = init_critic_params(kp1, input_dims, fc1_dims, fc2_dims, n_actions)
    params_q2 = init_critic_params(kp2, input_dims, fc1_dims, fc2_dims, n_actions)
    state = jax.random.normal(ks, (batch, input_dims[0]), jnp.float32)
    action = jax.random.normal(ka, (batch, n_actions), jnp.float32)

    # Prepared parameter pytrees: built once, reused for every kernel call.
    prep_f32 = prepare_critic_params(params_q1)
    prep_bf16 = prepare_critic_params(params_q1, use_bf16=True)
    prep_twin = prepare_twin_params(params_q1, params_q2)

    # 1) f32 single-critic path (exact semantics of the PyTorch module).
    q1 = critic_apply(prep_f32, state, action)
    jax.block_until_ready(q1)
    assert q1.shape == (batch, 1)
    assert jnp.allclose(q1, critic_reference(state, action, params_q1),
                        atol=1e-4, rtol=1e-4), "f32 mismatch vs reference"

    # 2) bf16-streamed path (bandwidth optimization; matches bf16 reference).
    q1_bf = critic_apply(prep_bf16, state, action)
    jax.block_until_ready(q1_bf)
    q1_bf_ref = critic_reference(state, action, params_q1, dot_dtype=jnp.bfloat16)
    assert jnp.allclose(q1_bf, q1_bf_ref, atol=2e-2, rtol=2e-2), "bf16 mismatch"

    # 3) fused twin-critic path (lane-dense block-diagonal weights, one launch).
    tq1, tq2 = critic_twin_apply(prep_twin, state, action)
    jax.block_until_ready(tq2)
    assert jnp.allclose(tq1, critic_reference(state, action, params_q1),
                        atol=1e-4, rtol=1e-4), "twin q1 mismatch"
    assert jnp.allclose(tq2, critic_reference(state, action, params_q2),
                        atol=1e-4, rtol=1e-4), "twin q2 mismatch"

    # 4) batch-tiled path (explicit smaller tile -> grid > 1, resident weights).
    big_state = jax.random.normal(ks2, (1024, input_dims[0]), jnp.float32)
    big_action = jax.random.normal(ka2, (1024, n_actions), jnp.float32)
    q_big = critic_apply(prep_f32, big_state, big_action, batch_tile=512)
    jax.block_until_ready(q_big)
    assert q_big.shape == (1024, 1)
    ref_big = critic_reference(big_state, big_action, params_q1)
    assert jnp.allclose(q_big, ref_big, atol=1e-4, rtol=1e-4), "tiled mismatch"

    # 5) explicit 2-TensorCore split (what auto-detection selects on v7x).
    q_mc = critic_apply(prep_f32, big_state, big_action, num_cores=2)
    jax.block_until_ready(q_mc)
    assert jnp.allclose(q_mc, ref_big, atol=1e-4, rtol=1e-4), "megacore mismatch"

    print("KERNEL_OK")
</pallas_src>

<mosaic_0001>
module attributes {stable_mosaic.version = 11 : i64} {
  func.func @_mlp_kernel(%arg0: i32, %arg1: memref<8x40xf32, #tpu.memory_space<vmem>>, %arg2: memref<40x64xf32, #tpu.memory_space<vmem>>, %arg3: memref<1x64xf32, #tpu.memory_space<vmem>>, %arg4: memref<64x64xf32, #tpu.memory_space<vmem>>, %arg5: memref<1x64xf32, #tpu.memory_space<vmem>>, %arg6: memref<64x1xf32, #tpu.memory_space<vmem>>, %arg7: memref<1x1xf32, #tpu.memory_space<vmem>>, %arg8: memref<8x1xf32, #tpu.memory_space<vmem>>) attributes {dimension_semantics = [#tpu.dimension_semantics<parallel>], iteration_bounds = array<i64: 1>, scalar_prefetch = 0 : i64, scratch_operands = 0 : i64, tpu.core_type = #tpu.core_type<tc>, window_params = [{transform_indices = @transform_0, window_bounds = array<i64: 8, 40>}, {pipeline_mode = #tpu.pipeline_mode<synchronous>, transform_indices = @transform_1, window_bounds = array<i64: 40, 64>}, {pipeline_mode = #tpu.pipeline_mode<synchronous>, transform_indices = @transform_2, window_bounds = array<i64: 1, 64>}, {pipeline_mode = #tpu.pipeline_mode<synchronous>, transform_indices = @transform_3, window_bounds = array<i64: 64, 64>}, {pipeline_mode = #tpu.pipeline_mode<synchronous>, transform_indices = @transform_4, window_bounds = array<i64: 1, 64>}, {pipeline_mode = #tpu.pipeline_mode<synchronous>, transform_indices = @transform_5, window_bounds = array<i64: 64, 1>}, {pipeline_mode = #tpu.pipeline_mode<synchronous>, transform_indices = @transform_6, window_bounds = array<i64: 1, 1>}, {transform_indices = @transform_7, window_bounds = array<i64: 8, 1>}]} {
    %c0 = arith.constant 0 : index
    %c0_0 = arith.constant 0 : index
    %0 = vector.load %arg1[%c0, %c0_0] : memref<8x40xf32, #tpu.memory_space<vmem>>, vector<8x40xf32>
    %c0_1 = arith.constant 0 : index
    %c0_2 = arith.constant 0 : index
    %1 = vector.load %arg2[%c0_1, %c0_2] : memref<40x64xf32, #tpu.memory_space<vmem>>, vector<40x64xf32>
    %cst = arith.constant dense<0.000000e+00> : vector<8x64xf32>
    %2 = tpu.matmul %0, %1, %cst {dimension_numbers = #tpu.dot_dimension_numbers<[1], [0], [0], [1], [0, 0, 1, 1], [], []>} : vector<8x40xf32>, vector<40x64xf32>, vector<8x64xf32> -> vector<8x64xf32>
    %c0_3 = arith.constant 0 : index
    %c0_4 = arith.constant 0 : index
    %3 = vector.load %arg3[%c0_3, %c0_4] : memref<1x64xf32, #tpu.memory_space<vmem>>, vector<1x64xf32>
    %4 = vector.broadcast %3 : vector<1x64xf32> to vector<8x64xf32>
    %5 = arith.addf %2, %4 : vector<8x64xf32>
    %cst_5 = arith.constant 0.000000e+00 : f32
    %6 = vector.broadcast %cst_5 : f32 to vector<8x64xf32>
    %7 = arith.maximumf %5, %6 : vector<8x64xf32>
    %c0_6 = arith.constant 0 : index
    %c0_7 = arith.constant 0 : index
    %8 = vector.load %arg4[%c0_6, %c0_7] : memref<64x64xf32, #tpu.memory_space<vmem>>, vector<64x64xf32>
    %cst_8 = arith.constant dense<0.000000e+00> : vector<8x64xf32>
    %9 = tpu.matmul %7, %8, %cst_8 {dimension_numbers = #tpu.dot_dimension_numbers<[1], [0], [0], [1], [0, 0, 1, 1], [], []>} : vector<8x64xf32>, vector<64x64xf32>, vector<8x64xf32> -> vector<8x64xf32>
    %c0_9 = arith.constant 0 : index
    %c0_10 = arith.constant 0 : index
    %10 = vector.load %arg5[%c0_9, %c0_10] : memref<1x64xf32, #tpu.memory_space<vmem>>, vector<1x64xf32>
    %11 = vector.broadcast %10 : vector<1x64xf32> to vector<8x64xf32>
    %12 = arith.addf %9, %11 : vector<8x64xf32>
    %cst_11 = arith.constant 0.000000e+00 : f32
    %13 = vector.broadcast %cst_11 : f32 to vector<8x64xf32>
    %14 = arith.maximumf %12, %13 : vector<8x64xf32>
    %c0_12 = arith.constant 0 : index
    %c0_13 = arith.constant 0 : index
    %15 = vector.load %arg6[%c0_12, %c0_13] : memref<64x1xf32, #tpu.memory_space<vmem>>, vector<64x1xf32>
    %cst_14 = arith.constant dense<0.000000e+00> : vector<8x1xf32>
    %16 = tpu.matmul %14, %15, %cst_14 {dimension_numbers = #tpu.dot_dimension_numbers<[1], [0], [0], [1], [0, 0, 1, 1], [], []>} : vector<8x64xf32>, vector<64x1xf32>, vector<8x1xf32> -> vector<8x1xf32>
    %c0_15 = arith.constant 0 : index
    %c0_16 = arith.constant 0 : index
    %17 = vector.load %arg7[%c0_15, %c0_16] : memref<1x1xf32, #tpu.memory_space<vmem>>, vector<1x1xf32>
    %18 = vector.broadcast %17 : vector<1x1xf32> to vector<8x1xf32>
    %19 = arith.addf %16, %18 : vector<8x1xf32>
    %c0_17 = arith.constant 0 : index
    %c0_18 = arith.constant 0 : index
    %20 = vector.load %arg8[%c0_17, %c0_18] : memref<8x1xf32, #tpu.memory_space<vmem>>, vector<8x1xf32>
    tpu.vector_store %arg8[%c0_17, %c0_18], %19 {strides = array<i32>} : memref<8x1xf32, #tpu.memory_space<vmem>>, vector<8x1xf32>,
    return
  }
  func.func @transform_0(%arg0: i32) -> (i32, i32) {
    %c0_i32 = arith.constant 0 : i32
    %c0_i32_0 = arith.constant 0 : i32
    return %arg0, %c0_i32 : i32, i32
  }
  func.func @transform_1(%arg0: i32) -> (i32, i32) {
    %c0_i32 = arith.constant 0 : i32
    %c0_i32_0 = arith.constant 0 : i32
    %c0_i32_1 = arith.constant 0 : i32
    return %c0_i32, %c0_i32_0 : i32, i32
  }
  func.func @transform_2(%arg0: i32) -> (i32, i32) {
    %c0_i32 = arith.constant 0 : i32
    %c0_i32_0 = arith.constant 0 : i32
    %c0_i32_1 = arith.constant 0 : i32
    return %c0_i32, %c0_i32_0 : i32, i32
  }
  func.func @transform_3(%arg0: i32) -> (i32, i32) {
    %c0_i32 = arith.constant 0 : i32
    %c0_i32_0 = arith.constant 0 : i32
    %c0_i32_1 = arith.constant 0 : i32
    return %c0_i32, %c0_i32_0 : i32, i32
  }
  func.func @transform_4(%arg0: i32) -> (i32, i32) {
    %c0_i32 = arith.constant 0 : i32
    %c0_i32_0 = arith.constant 0 : i32
    %c0_i32_1 = arith.constant 0 : i32
    return %c0_i32, %c0_i32_0 : i32, i32
  }
  func.func @transform_5(%arg0: i32) -> (i32, i32) {
    %c0_i32 = arith.constant 0 : i32
    %c0_i32_0 = arith.constant 0 : i32
    %c0_i32_1 = arith.constant 0 : i32
    return %c0_i32, %c0_i32_0 : i32, i32
  }
  func.func @transform_6(%arg0: i32) -> (i32, i32) {
    %c0_i32 = arith.constant 0 : i32
    %c0_i32_0 = arith.constant 0 : i32
    %c0_i32_1 = arith.constant 0 : i32
    return %c0_i32, %c0_i32_0 : i32, i32
  }
  func.func @transform_7(%arg0: i32) -> (i32, i32) {
    %c0_i32 = arith.constant 0 : i32
    %c0_i32_0 = arith.constant 0 : i32
    return %arg0, %c0_i32 : i32, i32
  }
}

</mosaic_0001>

<bundles_post_ra>
// kernel: critic_apply.1
= control target key start
LH: loop header
LB: loop body
LE: loop exit
PB: predicated region body
PF: predicated region fallthrough
CT: control target
= control target key end

     0   :  { %s563_s0 = inlined_call_operand.vmem [shape: f32[8,40], index: 0, kind: input, shape index: {}]   ;;  %s564_s1 = inlined_call_operand.hbm [shape: f32[40,64], index: 1, kind: input, shape index: {}]   ;;  %s565_s2 = inlined_call_operand.vmem [shape: f32[1,64], index: 2, kind: input, shape index: {}]   ;;  %s566_s3 = inlined_call_operand.vmem [shape: f32[64,64], index: 3, kind: input, shape index: {}]   ;;  %s567_s4 = inlined_call_operand.vmem [shape: f32[1,64], index: 4, kind: input, shape index: {}]   ;;  %s568_s5 = inlined_call_operand.vmem [shape: f32[64,1], index: 5, kind: input, shape index: {}]   ;;  %s569_s6 = inlined_call_operand.<no memory space> [shape: f32[1,1], index: 6, kind: input, shape index: {}]   ;;  %s570_s7 = inlined_call_operand.vmem [shape: f32[8,1], index: 7, kind: output, shape index: {}]  }
   0x1   :  { %v12_v0 = vstv %s569_s6 }
   0x2   :  { %13 = vst [vmem:[#allocation2] sm:$0x1] %v12_v0 }
   0x3   :  { %14 = vsyncpa [#allocation4], 0  ;;  %s423_s26 = smov [#allocation3]  }
   0x4   :  { %s22_s27 = sshll.u32 %s423_s26, 4  ;;  %s23_s27 = int_to_ptr.vmem [resolvable:$true] %s22_s27 }
   0x5   :  { %s409_s28 = scalar_lea.vmem %s23_s27, 640  ;;  %p414_p1 = scmp.lt.s32.totalorder %s23_s27, %s23_s27 }
   0x6   :  { %p410_p0 = scmp.ne.s32.totalorder %s23_s27, %s409_s28  ;;  %p415_p2 = scmp.lt.s32.totalorder %s409_s28, %s409_s28 }
   0x8   :  { %p416_p3 = por %p415_p2, %p414_p1 }
   0xa   :  { %p417_p4 = pnand %p416_p3, %p410_p0 }
   0xc   :  { %420 = shalt.err (!%p417_p4)
}
   0xd   :  { %s424_s29 = smov 128   ;;  %s425_s30 = smov 8  }
   0xe   :  { %28 = dma.hbm_to_vmem [thread:$0]  %s564_s1, 640, %s23_s27, [#allocation4], %s424_s29, %s424_s29, %s425_s30  }
   0xf   :  { %421 = dma.done.wait [#allocation4], 640  }
  0x10   :  { %422 = vsyncadd [#allocation4], 4294966656  ;;  %v426_v1 = vmov 0.0   ;;  %vm427_vm0 = vmmov 0   ;;  %v47_v2 = vld [vmem:[#allocation3 + $0x20] sm:$0xff]  ;;  %v46_v3 = vld [vmem:[#allocation3 + $0x18] sm:$0xff] }
  0x11   :  { %345 = vmatprep.subr.mxu0 %v426_v1  ;;  %355 = vmatprep.mubr.msk.f32.mxu0 %vm427_vm0, %v426_v1  ;;  %v45_v4 = vld [vmem:[#allocation3 + $0x10] sm:$0xff]  ;;  %v44_v7 = vld [vmem:[#allocation3 + $0x8] sm:$0xff]  ;;  %v43_v9 = vld [vmem:[#allocation3] sm:$0xff]  ;;  %vm55_vm1 = vcmask 326656   ;;  %vm145_vm2 = vcmask 523264   ;;  %vm308_vm3 = vcmask 7168  }
  0x12   :  { %358 = vmatprep.subr.mxu1 %v426_v1  ;;  %374 = vmatprep.mubr.msk.f32.mxu1 %vm427_vm0, %v426_v1  ;;  %v137_v5 = vld [vmem:[%s566_s3 + $0x38] sm:$0xff]  ;;  %v136_v6 = vld [vmem:[%s566_s3 + $0x30] sm:$0xff]  ;;  %v135_v8 = vld [vmem:[%s566_s3 + $0x28] sm:$0xff] }
  0x13   :  { %346 = vmatpush3.msra.mxu0 %v47_v2  ;;  %359 = vmatpush3.msra.mxu1 %v137_v5  ;;  %v134_v10 = vld [vmem:[%s566_s3 + $0x20] sm:$0xff]  ;;  %v133_v12 = vld [vmem:[%s566_s3 + $0x18] sm:$0xff]  ;;  %v132_v13 = vld [vmem:[%s566_s3 + $0x10] sm:$0xff] }
  0x14   :  { %347 = vmatprep.subr.mxu0 %v426_v1  ;;  %360 = vmatprep.subr.mxu1 %v426_v1  ;;  %v42_v11 = vld [vmem:[%s563_s0] sm:$0xff]  ;;  %v131_v14 = vld [vmem:[%s566_s3 + $0x8] sm:$0xff]  ;;  %v227_v16 = vld [vmem:[%s568_s5 + $0x38] sm:$0xff] }
  0x15   :  { %348 = vmatpush3.msra.mxu0 %v46_v3  ;;  %361 = vmatpush3.msra.mxu1 %v136_v6  ;;  %v130_v15 = vld [vmem:[%s566_s3] sm:$0xff]  ;;  %v226_v17 = vld [vmem:[%s568_s5 + $0x30] sm:$0xff]  ;;  %v225_v18 = vld [vmem:[%s568_s5 + $0x28] sm:$0xff] }
  0x16   :  { %349 = vmatprep.subr.mxu0 %v426_v1  ;;  %362 = vmatprep.subr.mxu1 %v426_v1  ;;  %v224_v19 = vld [vmem:[%s568_s5 + $0x20] sm:$0xff]  ;;  %v223_v20 = vld [vmem:[%s568_s5 + $0x18] sm:$0xff]  ;;  %v222_v26 = vld [vmem:[%s568_s5 + $0x10] sm:$0xff] }
  0x17   :  { %350 = vmatpush3.msra.mxu0 %v45_v4  ;;  %363 = vmatpush3.msra.mxu1 %v135_v8  ;;  %v315_v21 = vld [vmem:[%s565_s2] ss:$0 sm:$0xff]  ;;  %v221_v27 = vld [vmem:[%s568_s5 + $0x8] sm:$0xff] }
  0x18   :  { %351 = vmatprep.subr.mxu0 %v426_v1  ;;  %364 = vmatprep.subr.mxu1 %v426_v1  ;;  %v220_v28 = vld [vmem:[%s568_s5] sm:$0xff] }
  0x19   :  { %352 = vmatpush3.msra.mxu0 %v44_v7  ;;  %365 = vmatpush3.msra.mxu1 %v134_v10  ;;  %v317_v29 = vld [vmem:[%s567_s4] ss:$0 sm:$0xff] }
  0x1a   :  { %353 = vmatprep.subr.mxu0 %v426_v1  ;;  %366 = vmatprep.subr.mxu1 %v426_v1  ;;  %v319_v34 = vld [vmem:[#allocation2] ss:$0 sm:$0xff] }
  0x1b   :  { %354 = vmatpush3.msra.mxu0 %v43_v9  ;;  %367 = vmatpush3.msra.mxu1 %v133_v12 }
  0x1c   :  { %356 = vmatmul.mubr.msk.f32.vlgmr.msra.gmra.mxu0 %vm55_vm1, %v42_v11  ;;  %377 = vmatprep.subr.mxu0 %v426_v1 }
  0x1d   :  { %368 = vmatprep.subr.mxu1 %v426_v1  ;;  %393 = vmatprep.mubr.msk.f32.mxu0 %vm427_vm0, %v426_v1 }
  0x1e   :  { %369 = vmatpush3.msra.mxu1 %v132_v13  ;;  %378 = vmatpush3.msra.mxu0 %v227_v16 }
  0x1f   :  { %370 = vmatprep.subr.mxu1 %v426_v1  ;;  %379 = vmatprep.subr.mxu0 %v426_v1 }
  0x20   :  { %371 = vmatpush3.msra.mxu1 %v131_v14  ;;  %380 = vmatpush3.msra.mxu0 %v226_v17 }
  0x21   :  { %372 = vmatprep.subr.mxu1 %v426_v1  ;;  %381 = vmatprep.subr.mxu0 %v426_v1 }
  0x22   :  { %373 = vmatpush3.msra.mxu1 %v130_v15  ;;  %382 = vmatpush3.msra.mxu0 %v225_v18 }
  0x23   :  { %383 = vmatprep.subr.mxu0 %v426_v1 }
  0x24   :  { %384 = vmatpush3.msra.mxu0 %v224_v19 }
  0x25   :  { %385 = vmatprep.subr.mxu0 %v426_v1 }
  0x26   :  { %386 = vmatpush3.msra.mxu0 %v223_v20 }
  0x27   :  { %387 = vmatprep.subr.mxu0 %v426_v1 }
  0x28   :  { %388 = vmatpush3.msra.mxu0 %v222_v26 }
  0x29   :  { %389 = vmatprep.subr.mxu0 %v426_v1 }
  0x2a   :  { %390 = vmatpush3.msra.mxu0 %v221_v27 }
  0x2b   :  { %391 = vmatprep.subr.mxu0 %v426_v1 }
  0x2c   :  { %392 = vmatpush3.msra.mxu0 %v220_v28 }
  0xdc   :  { %v125_v22 = vpop.f32.mrf.mxu0 }
  0xdd   :  { %v126_v23 = vadd.f32 %v315_v21, %v125_v22 }
  0xde   :  { %v357_v24 = vpop.f32.mrf.mxu0 }
  0xdf   :  { %v129_v25 = vmax.f32 %v126_v23, 0.0 }
  0xe1   :  { %375 = vmatmul.mubr.msk.f32.vlgmr.msra.gmra.mxu1 %vm145_vm2, %v129_v25 }
 0x1a1   :  { %v215_v30 = vpop.f32.mrf.mxu1 }
 0x1a2   :  { %v216_v31 = vadd.f32 %v317_v29, %v215_v30 }
 0x1a3   :  { %v376_v32 = vpop.f32.mrf.mxu1 }
 0x1a4   :  { %v219_v33 = vmax.f32 %v216_v31, 0.0 }
 0x1a6   :  { %394 = vmatmul.mubr.msk.f32.vlgmr.msra.gmra.mxu0 %vm145_vm2, %v219_v33 }
 0x266   :  { %v304_v35 = vpop.f32.mrf.mxu0 }
 0x267   :  { %v305_v36 = vadd.f32 %v319_v34, %v304_v35 }
 0x268   :  { %v395_v37 = vpop.f32.mrf.mxu0 }
 0x269   :  { %309 = vst.msk [vmem:[%s570_s7] sm:$0xff] %vm308_vm3, %v305_v36 }
 0x26a   :  { %314 = vsyncpa [#allocation4], 1 }

</bundles_post_ra>
